<compile_context>
chip_gen: v7x
topology: tpu7x:2x2x1
jax: 0.10.0
libtpu: 0.0.40
codegen_flags: <defaults>
</compile_context>

<pallas_src>
import jax
import jax.numpy as jnp
from jax.experimental import pallas as pl
from jax.experimental.pallas import tpu as pltpu

_LANE = 128
_SUBLANE = 8


def _round_up(n, m):
    return ((n + m - 1) // m) * m


def mlp_kernel(x_ref, w0_ref, b0_ref, w1_ref, b1_ref, a0_ref, a1_ref):
    # x_ref:  (Bp, D0p)   w0_ref: (D0p, D1p)   b0_ref: (1, D1p)
    # w1_ref: (D1p, D2p)  b1_ref: (1, D2p)
    # a0_ref: (Bp, D1p)   a1_ref: (Bp, D2p)     (all lane/sublane aligned)
    x = x_ref[...]

    # linear_0: activity_0 = x @ W0^T + b0
    a0 = jnp.dot(x, w0_ref[...], preferred_element_type=jnp.float32) + b0_ref[...]
    a0_ref[...] = a0.astype(a0_ref.dtype)

    # relu_0 + linear_1: activity_1 = relu(a0) @ W1^T + b1
    h = jnp.maximum(a0, 0.0)
    a1 = jnp.dot(h, w1_ref[...], preferred_element_type=jnp.float32) + b1_ref[...]
    a1_ref[...] = a1.astype(a1_ref.dtype)


def neural_network_forward(x, w0, b0, w1, b1):
    """x: (B, ...) any trailing shape; w0: (D1, D0), b0: (D1,), w1: (D2, D1), b1: (D2,)."""
    B = x.shape[0]
    x_flat = x.reshape(B, -1)                       # nn.Flatten()
    D0 = x_flat.shape[1]
    D1, D2 = w0.shape[0], w1.shape[0]
    assert w0.shape == (D1, D0) and w1.shape == (D2, D1)
    assert b0.shape == (D1,) and b1.shape == (D2,)

    # Pad to hardware-friendly shapes: sublane (8) on batch, lane (128) on features.
    Bp = _round_up(B, _SUBLANE)
    D0p = _round_up(D0, _LANE)
    D1p = _round_up(D1, _LANE)
    D2p = _round_up(D2, _LANE)

    f32 = jnp.float32
    x_p = jnp.pad(x_flat.astype(f32), ((0, Bp - B), (0, D0p - D0)))
    w0_p = jnp.pad(jnp.transpose(w0).astype(f32), ((0, D0p - D0), (0, D1p - D1)))
    b0_p = jnp.pad(b0.astype(f32).reshape(1, D1), ((0, 0), (0, D1p - D1)))
    w1_p = jnp.pad(jnp.transpose(w1).astype(f32), ((0, D1p - D1), (0, D2p - D2)))
    b1_p = jnp.pad(b1.astype(f32).reshape(1, D2), ((0, 0), (0, D2p - D2)))

    vmem_spec = pl.BlockSpec(memory_space=pltpu.MemorySpace.VMEM)

    flops = 2 * Bp * D0p * D1p + 2 * Bp * D1p * D2p
    bytes_accessed = 4 * (
        Bp * D0p + D0p * D1p + D1p * D2p + D1p + D2p + Bp * D1p + Bp * D2p
    )

    a0_p, a1_p = pl.pallas_call(
        mlp_kernel,
        out_shape=(
            jax.ShapeDtypeStruct((Bp, D1p), f32),
            jax.ShapeDtypeStruct((Bp, D2p), f32),
        ),
        in_specs=[vmem_spec] * 5,
        out_specs=(vmem_spec, vmem_spec),
        cost_estimate=pl.CostEstimate(
            flops=flops, transcendentals=0, bytes_accessed=bytes_accessed
        ),
    )(x_p, w0_p, b0_p, w1_p, b1_p)

    # Slice the valid region back out (padding is exact zeros through the math).
    return a0_p[:B, :D1], a1_p[:B, :D2]


neural_network_forward_jit = jax.jit(neural_network_forward)


if __name__ == "__main__":
    # architecture = (64, 32, 16); input x of shape (2, 4, 4, 4) flattens to 64.
    architecture = (64, 32, 16)
    B = 2
    key = jax.random.PRNGKey(0)
    kx, kw0, kb0, kw1, kb1 = jax.random.split(key, 5)

    x = jax.random.normal(kx, (B, 4, 4, 4), dtype=jnp.float32)
    # Deterministic synthetic parameters (PyTorch Linear convention: W is (out, in)).
    w0 = jax.random.normal(kw0, (architecture[1], architecture[0]), dtype=jnp.float32) * 0.1
    b0 = jax.random.normal(kb0, (architecture[1],), dtype=jnp.float32) * 0.1
    w1 = jax.random.normal(kw1, (architecture[2], architecture[1]), dtype=jnp.float32) * 0.1
    b1 = jax.random.normal(kb1, (architecture[2],), dtype=jnp.float32) * 0.1

    a0, a1 = neural_network_forward_jit(x, w0, b0, w1, b1)
    jax.block_until_ready((a0, a1))

    # Pure-JAX reference check of the PyTorch forward semantics.
    x_flat = x.reshape(B, -1)
    ref_a0 = x_flat @ w0.T + b0
    ref_a1 = jnp.maximum(ref_a0, 0.0) @ w1.T + b1
    assert a0.shape == (B, architecture[1]) and a1.shape == (B, architecture[2])
    assert jnp.allclose(a0, ref_a0, atol=1e-5, rtol=1e-5)
    assert jnp.allclose(a1, ref_a1, atol=1e-5, rtol=1e-5)

    print("KERNEL_OK")
</pallas_src>

<mosaic_0001>
module attributes {stable_mosaic.version = 11 : i64} {
  func.func @mlp_kernel(%arg0: memref<8x128xf32, #tpu.memory_space<vmem>>, %arg1: memref<128x128xf32, #tpu.memory_space<vmem>>, %arg2: memref<1x128xf32, #tpu.memory_space<vmem>>, %arg3: memref<128x128xf32, #tpu.memory_space<vmem>>, %arg4: memref<1x128xf32, #tpu.memory_space<vmem>>, %arg5: memref<8x128xf32, #tpu.memory_space<vmem>>, %arg6: memref<8x128xf32, #tpu.memory_space<vmem>>) attributes {dimension_semantics = [], scalar_prefetch = 0 : i64, scratch_operands = 0 : i64, tpu.core_type = #tpu.core_type<tc>} {
    %c0 = arith.constant 0 : index
    %c0_0 = arith.constant 0 : index
    %0 = vector.load %arg0[%c0, %c0_0] : memref<8x128xf32, #tpu.memory_space<vmem>>, vector<8x128xf32>
    %c0_1 = arith.constant 0 : index
    %c0_2 = arith.constant 0 : index
    %1 = vector.load %arg1[%c0_1, %c0_2] : memref<128x128xf32, #tpu.memory_space<vmem>>, vector<128x128xf32>
    %cst = arith.constant dense<0.000000e+00> : vector<8x128xf32>
    %2 = tpu.matmul %0, %1, %cst {dimension_numbers = #tpu.dot_dimension_numbers<[1], [0], [0], [1], [0, 0, 1, 1], [], []>} : vector<8x128xf32>, vector<128x128xf32>, vector<8x128xf32> -> vector<8x128xf32>
    %c0_3 = arith.constant 0 : index
    %c0_4 = arith.constant 0 : index
    %3 = vector.load %arg2[%c0_3, %c0_4] : memref<1x128xf32, #tpu.memory_space<vmem>>, vector<1x128xf32>
    %4 = vector.broadcast %3 : vector<1x128xf32> to vector<8x128xf32>
    %5 = arith.addf %2, %4 : vector<8x128xf32>
    %c0_5 = arith.constant 0 : index
    %c0_6 = arith.constant 0 : index
    %6 = vector.load %arg5[%c0_5, %c0_6] : memref<8x128xf32, #tpu.memory_space<vmem>>, vector<8x128xf32>
    tpu.vector_store %arg5[%c0_5, %c0_6], %5 {strides = array<i32>} : memref<8x128xf32, #tpu.memory_space<vmem>>, vector<8x128xf32>,
    %cst_7 = arith.constant 0.000000e+00 : f32
    %7 = vector.broadcast %cst_7 : f32 to vector<8x128xf32>
    %8 = arith.maximumf %5, %7 : vector<8x128xf32>
    %c0_8 = arith.constant 0 : index
    %c0_9 = arith.constant 0 : index
    %9 = vector.load %arg3[%c0_8, %c0_9] : memref<128x128xf32, #tpu.memory_space<vmem>>, vector<128x128xf32>
    %cst_10 = arith.constant dense<0.000000e+00> : vector<8x128xf32>
    %10 = tpu.matmul %8, %9, %cst_10 {dimension_numbers = #tpu.dot_dimension_numbers<[1], [0], [0], [1], [0, 0, 1, 1], [], []>} : vector<8x128xf32>, vector<128x128xf32>, vector<8x128xf32> -> vector<8x128xf32>
    %c0_11 = arith.constant 0 : index
    %c0_12 = arith.constant 0 : index
    %11 = vector.load %arg4[%c0_11, %c0_12] : memref<1x128xf32, #tpu.memory_space<vmem>>, vector<1x128xf32>
    %12 = vector.broadcast %11 : vector<1x128xf32> to vector<8x128xf32>
    %13 = arith.addf %10, %12 : vector<8x128xf32>
    %c0_13 = arith.constant 0 : index
    %c0_14 = arith.constant 0 : index
    %14 = vector.load %arg6[%c0_13, %c0_14] : memref<8x128xf32, #tpu.memory_space<vmem>>, vector<8x128xf32>
    tpu.vector_store %arg6[%c0_13, %c0_14], %13 {strides = array<i32>} : memref<8x128xf32, #tpu.memory_space<vmem>>, vector<8x128xf32>,
    return
  }
}

</mosaic_0001>

<bundles_post_ra>
// kernel: neural_network_forward.1
= control target key start
LH: loop header
LB: loop body
LE: loop exit
PB: predicated region body
PF: predicated region fallthrough
CT: control target
= control target key end

     0   :  { %v377_v0 = vmov 0.0|0.0   ;;  %vm378_vm0 = vmmov 0   ;;  %v379_v4 = vmov 0.0   ;;  %s542_s1 = inlined_call_operand.vmem [shape: f32[128,128], index: 1, kind: input, shape index: {}]   ;;  %s543_s3 = inlined_call_operand.vmem [shape: f32[128,128], index: 3, kind: input, shape index: {}]   ;;  %s544_s0 = inlined_call_operand.vmem [shape: f32[8,128], index: 0, kind: input, shape index: {}]   ;;  %s545_s2 = inlined_call_operand.vmem [shape: f32[1,128], index: 2, kind: input, shape index: {}]   ;;  %s546_s5 = inlined_call_operand.vmem [shape: f32[8,128], index: 5, kind: output, shape index: {0}]   ;;  %s547_s4 = inlined_call_operand.vmem [shape: f32[1,128], index: 4, kind: input, shape index: {}]   ;;  %s548_s6 = inlined_call_operand.vmem [shape: f32[8,128], index: 6, kind: output, shape index: {1}]  }
   0x1   :  { %326 = vmatprep.subr.bf16.mxu0 %v377_v0  ;;  %v23_v1 = vld [vmem:[%s542_s1] sm:$0xff]  ;;  %v24_v2 = vld [vmem:[%s542_s1 + $0x8] sm:$0xff]  ;;  %v25_v3 = vld [vmem:[%s542_s1 + $0x10] sm:$0xff]  ;;  %288 = vmatprep.mubr.msk.f32.mxu0 %vm378_vm0, %v379_v4 }
   0x2   :  { %v327_v5 = vpack.c.bf16 %v24_v2, %v23_v1  ;;  %v26_v6 = vld [vmem:[%s542_s1 + $0x18] sm:$0xff]  ;;  %350 = vmatprep.subr.bf16.mxu1 %v377_v0  ;;  %323 = vmatprep.mubr.msk.f32.mxu1 %vm378_vm0, %v379_v4  ;;  %v27_v8 = vld [vmem:[%s542_s1 + $0x20] sm:$0xff]  ;;  %v28_v9 = vld [vmem:[%s542_s1 + $0x28] sm:$0xff] }
   0x3   :  { %v330_v7 = vpack.c.bf16 %v26_v6, %v25_v3  ;;  %v118_v10 = vld [vmem:[%s543_s3] sm:$0xff]  ;;  %v119_v11 = vld [vmem:[%s543_s3 + $0x8] sm:$0xff]  ;;  %v120_v12 = vld [vmem:[%s543_s3 + $0x10] sm:$0xff]  ;;  %v333_v14 = vpack.c.bf16 %v28_v9, %v27_v8 }
   0x4   :  { %328 = vmatpush3.bf16.msra.mxu0 %v327_v5  ;;  %v121_v13 = vld [vmem:[%s543_s3 + $0x18] sm:$0xff]  ;;  %v351_v15 = vpack.c.bf16 %v119_v11, %v118_v10  ;;  %v29_v16 = vld [vmem:[%s542_s1 + $0x30] sm:$0xff]  ;;  %v122_v19 = vld [vmem:[%s543_s3 + $0x20] sm:$0xff] }
   0x5   :  { %329 = vmatprep.subr.bf16.mxu0 %v377_v0  ;;  %v30_v17 = vld [vmem:[%s542_s1 + $0x38] sm:$0xff]  ;;  %v354_v18 = vpack.c.bf16 %v121_v13, %v120_v12  ;;  %v123_v20 = vld [vmem:[%s543_s3 + $0x28] sm:$0xff]  ;;  %v31_v22 = vld [vmem:[%s542_s1 + $0x40] sm:$0xff] }
   0x6   :  { %352 = vmatpush3.bf16.msra.mxu1 %v351_v15  ;;  %v336_v21 = vpack.c.bf16 %v30_v17, %v29_v16  ;;  %v32_v23 = vld [vmem:[%s542_s1 + $0x48] sm:$0xff]  ;;  %v357_v24 = vpack.c.bf16 %v123_v20, %v122_v19  ;;  %v124_v25 = vld [vmem:[%s543_s3 + $0x30] sm:$0xff]  ;;  %v125_v26 = vld [vmem:[%s543_s3 + $0x38] sm:$0xff] }
   0x7   :  { %353 = vmatprep.subr.bf16.mxu1 %v377_v0  ;;  %v339_v27 = vpack.c.bf16 %v32_v23, %v31_v22  ;;  %v33_v28 = vld [vmem:[%s542_s1 + $0x50] sm:$0xff]  ;;  %v34_v29 = vld [vmem:[%s542_s1 + $0x58] sm:$0xff]  ;;  %v360_v30 = vpack.c.bf16 %v125_v26, %v124_v25  ;;  %v126_v31 = vld [vmem:[%s543_s3 + $0x40] sm:$0xff] }
   0x8   :  { %331 = vmatpush3.bf16.msra.mxu0 %v330_v7  ;;  %v127_v32 = vld [vmem:[%s543_s3 + $0x48] sm:$0xff]  ;;  %v342_v33 = vpack.c.bf16 %v34_v29, %v33_v28  ;;  %v35_v34 = vld [vmem:[%s542_s1 + $0x60] sm:$0xff]  ;;  %v128_v37 = vld [vmem:[%s543_s3 + $0x50] sm:$0xff] }
   0x9   :  { %332 = vmatprep.subr.bf16.mxu0 %v377_v0  ;;  %v36_v35 = vld [vmem:[%s542_s1 + $0x68] sm:$0xff]  ;;  %v363_v36 = vpack.c.bf16 %v127_v32, %v126_v31  ;;  %v129_v38 = vld [vmem:[%s543_s3 + $0x58] sm:$0xff]  ;;  %v37_v40 = vld [vmem:[%s542_s1 + $0x70] sm:$0xff] }
   0xa   :  { %355 = vmatpush3.bf16.msra.mxu1 %v354_v18  ;;  %v345_v39 = vpack.c.bf16 %v36_v35, %v35_v34  ;;  %v38_v41 = vld [vmem:[%s542_s1 + $0x78] sm:$0xff]  ;;  %v366_v42 = vpack.c.bf16 %v129_v38, %v128_v37  ;;  %v130_v43 = vld [vmem:[%s543_s3 + $0x60] sm:$0xff]  ;;  %v131_v44 = vld [vmem:[%s543_s3 + $0x68] sm:$0xff] }
   0xb   :  { %356 = vmatprep.subr.bf16.mxu1 %v377_v0  ;;  %v348_v45 = vpack.c.bf16 %v38_v41, %v37_v40  ;;  %v369_v46 = vpack.c.bf16 %v131_v44, %v130_v43  ;;  %v22_v47 = vld [vmem:[%s544_s0] sm:$0xff]  ;;  %v132_v48 = vld [vmem:[%s543_s3 + $0x70] sm:$0xff]  ;;  %v133_v49 = vld [vmem:[%s543_s3 + $0x78] sm:$0xff] }
   0xc   :  { %334 = vmatpush3.bf16.msra.mxu0 %v333_v14  ;;  %v372_v50 = vpack.c.bf16 %v133_v49, %v132_v48  ;;  %v220_v51 = vld [vmem:[%s545_s2] ss:$0 sm:$0xff] }
   0xd   :  { %335 = vmatprep.subr.bf16.mxu0 %v377_v0  ;;  %v221_v56 = vld [vmem:[%s547_s4] ss:$0 sm:$0xff] }
   0xe   :  { %358 = vmatpush3.bf16.msra.mxu1 %v357_v24 }
   0xf   :  { %359 = vmatprep.subr.bf16.mxu1 %v377_v0 }
  0x10   :  { %337 = vmatpush3.bf16.msra.mxu0 %v336_v21 }
  0x11   :  { %338 = vmatprep.subr.bf16.mxu0 %v377_v0 }
  0x12   :  { %361 = vmatpush3.bf16.msra.mxu1 %v360_v30 }
  0x13   :  { %362 = vmatprep.subr.bf16.mxu1 %v377_v0 }
  0x14   :  { %340 = vmatpush3.bf16.msra.mxu0 %v339_v27 }
  0x15   :  { %341 = vmatprep.subr.bf16.mxu0 %v377_v0 }
  0x16   :  { %364 = vmatpush3.bf16.msra.mxu1 %v363_v36 }
  0x17   :  { %365 = vmatprep.subr.bf16.mxu1 %v377_v0 }
  0x18   :  { %343 = vmatpush3.bf16.msra.mxu0 %v342_v33 }
  0x19   :  { %344 = vmatprep.subr.bf16.mxu0 %v377_v0 }
  0x1a   :  { %367 = vmatpush3.bf16.msra.mxu1 %v366_v42 }
  0x1b   :  { %368 = vmatprep.subr.bf16.mxu1 %v377_v0 }
  0x1c   :  { %346 = vmatpush3.bf16.msra.mxu0 %v345_v39 }
  0x1d   :  { %347 = vmatprep.subr.bf16.mxu0 %v377_v0 }
  0x1e   :  { %370 = vmatpush3.bf16.msra.mxu1 %v369_v46 }
  0x1f   :  { %371 = vmatprep.subr.bf16.mxu1 %v377_v0 }
  0x20   :  { %349 = vmatpush3.bf16.msra.mxu0 %v348_v45 }
  0x22   :  { %373 = vmatpush3.bf16.msra.mxu1 %v372_v50 }
  0x23   :  { %289 = vmatmul.mubr.f32.vlgmr.msra.gmra.mrb[0].mxu0 %v22_v47 }
  0xf6   :  { %v112_v52 = vpop.f32.mrb[0].mxu0 }
  0xf7   :  { %v113_v53 = vadd.f32 %v220_v51, %v112_v52  ;;  %v290_v54 = vpop.f32.mrb[1].mxu0 }
  0xf9   :  { %116 = vst [vmem:[%s546_s5] sm:$0xff] %v113_v53  ;;  %v117_v55 = vmax.f32 %v113_v53, 0.0 }
  0xfb   :  { %324 = vmatmul.mubr.f32.vlgmr.msra.gmra.mrb[0].mxu1 %v117_v55 }
 0x1ce   :  { %v207_v57 = vpop.f32.mrb[0].mxu1 }
 0x1cf   :  { %v208_v58 = vadd.f32 %v221_v56, %v207_v57  ;;  %v325_v59 = vpop.f32.mrb[1].mxu1 }
 0x1d1   :  { %211 = vst [vmem:[%s548_s6] sm:$0xff] %v208_v58 }

</bundles_post_ra>
